<compile_context>
chip_gen: v6e
topology: v6e:2x2x1
jax: 0.10.0
libtpu: 0.0.40
codegen_flags: <defaults>
</compile_context>

<pallas_src>
import functools

import jax
import jax.numpy as jnp
from jax.experimental import pallas as pl
from jax.experimental.pallas import tpu as pltpu


# Acklam's inverse standard-normal CDF coefficients.
_A = (-3.969683028665376e+01, 2.209460984245205e+02, -2.759285104469687e+02,
      1.383577518672690e+02, -3.066479806614716e+01, 2.506628277459239e+00)
_B = (-5.447609879822406e+01, 1.615858368580409e+02, -1.556989798598866e+02,
      6.680131188771972e+01, -1.328068155288572e+01)
_C = (-7.784894002430293e-03, -3.223964580411365e-01, -2.400758277161838e+00,
      -2.549732539343734e+00, 4.374664141464968e+00, 2.938163982698783e+00)
_D = (7.784695709041462e-03, 3.224671290700398e-01, 2.445134137142996e+00,
      3.754408661907416e+00)
_P_LOW = 0.02425  # central / tail split point


def _inv_normal_cdf(p):
    """Standard-normal inverse CDF (Acklam). p must lie strictly in (0, 1).

    Uses only mul/add/div/sqrt/log/compare/select, so it lowers on the VPU/EUP
    (no trig, no erfinv) and also runs under interpret mode.
    """
    a1, a2, a3, a4, a5, a6 = _A
    b1, b2, b3, b4, b5 = _B
    c1, c2, c3, c4, c5, c6 = _C
    d1, d2, d3, d4 = _D

    # Central region.
    q = p - 0.5
    r = q * q
    num_c = (((((a1 * r + a2) * r + a3) * r + a4) * r + a5) * r + a6) * q
    den_c = ((((b1 * r + b2) * r + b3) * r + b4) * r + b5) * r + 1.0
    x_central = num_c / den_c

    # Lower tail (p < _P_LOW).
    ql = jnp.sqrt(-2.0 * jnp.log(p))
    x_low = (((((c1 * ql + c2) * ql + c3) * ql + c4) * ql + c5) * ql + c6) / (
        (((d1 * ql + d2) * ql + d3) * ql + d4) * ql + 1.0)

    # Upper tail (p > 1 - _P_LOW).
    qh = jnp.sqrt(-2.0 * jnp.log(1.0 - p))
    x_high = -(((((c1 * qh + c2) * qh + c3) * qh + c4) * qh + c5) * qh + c6) / (
        (((d1 * qh + d2) * qh + d3) * qh + d4) * qh + 1.0)

    x = jnp.where(p < _P_LOW, x_low, x_central)
    x = jnp.where(p > 1.0 - _P_LOW, x_high, x)
    return x


def latent_sample_kernel(bits_ref, out_ref):
    """bits_ref: (TB, latent_dim) int32 random bits -> out_ref: N(0,1) samples."""
    bits = bits_ref[...]
    # Top-level trick: keep 23 random bits and center, so p is in
    # [2^-24, 1 - 2^-24] and both log(p) and log(1-p) are finite in float32.
    u = jnp.bitwise_and(bits, 0x007FFFFF).astype(jnp.float32)
    p = (u + 0.5) * (1.0 / 8388608.0)  # uniform in (0, 1), 23-bit resolution
    out_ref[...] = _inv_normal_cdf(p).astype(out_ref.dtype)


@functools.partial(jax.jit, static_argnames=("bs", "latent_dim", "block_rows"))
def latent_distribution_forward(key, *, bs: int, latent_dim: int, block_rows: int = 512):
    """Pallas equivalent of LatentDistribution.forward(bs): N(0,1) samples of
    shape (bs, latent_dim), float32. `key` is a device-side jax.random key."""
    # Decorrelated per-element bits from the standard JAX PRNG (stays on device,
    # inside this jit). Bitcast to int32 — the safe integer dtype for Mosaic.
    bits = jax.random.bits(key, (bs, latent_dim), dtype=jnp.uint32)
    bits = jax.lax.bitcast_convert_type(bits, jnp.int32)

    # Tile the batch axis; keep latent_dim whole on the lane axis (lane-dense
    # writebacks). 512 rows * 128 lanes * 4 B = 256 KiB per block — with
    # double-buffered input + output that is ~1 MiB, comfortable on all of
    # v5e / v6e (128 MiB VMEM) and v7x (64 MiB VMEM).
    tb = bs if bs <= block_rows else block_rows
    grid = (pl.cdiv(bs, tb),)

    return pl.pallas_call(
        latent_sample_kernel,
        out_shape=jax.ShapeDtypeStruct((bs, latent_dim), jnp.float32),
        grid=grid,
        in_specs=[pl.BlockSpec((tb, latent_dim), lambda i: (i, 0))],
        out_specs=pl.BlockSpec((tb, latent_dim), lambda i: (i, 0)),
        compiler_params=pltpu.CompilerParams(
            dimension_semantics=("parallel",)),  # megacore-safe: bits are per-element
    )(bits)


if __name__ == "__main__":
    # args = {'latent_dim': 128}; forward(bs=8)
    bs = 8
    latent_dim = 128

    key = jax.random.PRNGKey(0)  # stays on device; no host-side seed sync
    z = latent_distribution_forward(key, bs=bs, latent_dim=latent_dim)
    z = jax.block_until_ready(z)

    assert z.shape == (bs, latent_dim)
    assert z.dtype == jnp.float32
    assert bool(jnp.isfinite(z).all())
    # Sanity: samples should look roughly standard normal (loose bounds).
    mean = float(jnp.mean(z))
    std = float(jnp.std(z))
    assert abs(mean) < 0.5, mean
    assert 0.5 < std < 1.5, std

    print("KERNEL_OK")
</pallas_src>

<mosaic_0001>
module attributes {stable_mosaic.version = 11 : i64} {
  func.func @latent_sample_kernel(%arg0: i32, %arg1: memref<8x128xi32, #tpu.memory_space<vmem>>, %arg2: memref<8x128xf32, #tpu.memory_space<vmem>>) attributes {dimension_semantics = [#tpu.dimension_semantics<parallel>], iteration_bounds = array<i64: 1>, scalar_prefetch = 0 : i64, scratch_operands = 0 : i64, tpu.core_type = #tpu.core_type<tc>, window_params = [{transform_indices = @transform_0, window_bounds = array<i64: 8, 128>}, {transform_indices = @transform_1, window_bounds = array<i64: 8, 128>}]} {
    %c0 = arith.constant 0 : index
    %c0_0 = arith.constant 0 : index
    %0 = vector.load %arg1[%c0, %c0_0] : memref<8x128xi32, #tpu.memory_space<vmem>>, vector<8x128xi32>
    %c8388607_i32 = arith.constant 8388607 : i32
    %1 = vector.broadcast %c8388607_i32 : i32 to vector<8x128xi32>
    %2 = arith.andi %0, %1 : vector<8x128xi32>
    %3 = arith.sitofp %2 : vector<8x128xi32> to vector<8x128xf32>
    %cst = arith.constant 5.000000e-01 : f32
    %4 = vector.broadcast %cst : f32 to vector<8x128xf32>
    %5 = arith.addf %3, %4 : vector<8x128xf32>
    %cst_1 = arith.constant 1.1920929E-7 : f32
    %6 = vector.broadcast %cst_1 : f32 to vector<8x128xf32>
    %7 = arith.mulf %5, %6 : vector<8x128xf32>
    %cst_2 = arith.constant 5.000000e-01 : f32
    %8 = vector.broadcast %cst_2 : f32 to vector<8x128xf32>
    %9 = arith.subf %7, %8 : vector<8x128xf32>
    %10 = arith.mulf %9, %9 : vector<8x128xf32>
    %cst_3 = arith.constant -39.6968307 : f32
    %11 = vector.broadcast %cst_3 : f32 to vector<8x128xf32>
    %12 = arith.mulf %11, %10 : vector<8x128xf32>
    %cst_4 = arith.constant 220.946106 : f32
    %13 = vector.broadcast %cst_4 : f32 to vector<8x128xf32>
    %14 = arith.addf %12, %13 : vector<8x128xf32>
    %15 = arith.mulf %14, %10 : vector<8x128xf32>
    %cst_5 = arith.constant -275.928497 : f32
    %16 = vector.broadcast %cst_5 : f32 to vector<8x128xf32>
    %17 = arith.addf %15, %16 : vector<8x128xf32>
    %18 = arith.mulf %17, %10 : vector<8x128xf32>
    %cst_6 = arith.constant 138.357758 : f32
    %19 = vector.broadcast %cst_6 : f32 to vector<8x128xf32>
    %20 = arith.addf %18, %19 : vector<8x128xf32>
    %21 = arith.mulf %20, %10 : vector<8x128xf32>
    %cst_7 = arith.constant -30.6647987 : f32
    %22 = vector.broadcast %cst_7 : f32 to vector<8x128xf32>
    %23 = arith.addf %21, %22 : vector<8x128xf32>
    %24 = arith.mulf %23, %10 : vector<8x128xf32>
    %cst_8 = arith.constant 2.50662827 : f32
    %25 = vector.broadcast %cst_8 : f32 to vector<8x128xf32>
    %26 = arith.addf %24, %25 : vector<8x128xf32>
    %27 = arith.mulf %26, %9 : vector<8x128xf32>
    %cst_9 = arith.constant -54.4760971 : f32
    %28 = vector.broadcast %cst_9 : f32 to vector<8x128xf32>
    %29 = arith.mulf %28, %10 : vector<8x128xf32>
    %cst_10 = arith.constant 161.585831 : f32
    %30 = vector.broadcast %cst_10 : f32 to vector<8x128xf32>
    %31 = arith.addf %29, %30 : vector<8x128xf32>
    %32 = arith.mulf %31, %10 : vector<8x128xf32>
    %cst_11 = arith.constant -155.698975 : f32
    %33 = vector.broadcast %cst_11 : f32 to vector<8x128xf32>
    %34 = arith.addf %32, %33 : vector<8x128xf32>
    %35 = arith.mulf %34, %10 : vector<8x128xf32>
    %cst_12 = arith.constant 66.8013153 : f32
    %36 = vector.broadcast %cst_12 : f32 to vector<8x128xf32>
    %37 = arith.addf %35, %36 : vector<8x128xf32>
    %38 = arith.mulf %37, %10 : vector<8x128xf32>
    %cst_13 = arith.constant -13.2806816 : f32
    %39 = vector.broadcast %cst_13 : f32 to vector<8x128xf32>
    %40 = arith.addf %38, %39 : vector<8x128xf32>
    %41 = arith.mulf %40, %10 : vector<8x128xf32>
    %cst_14 = arith.constant 1.000000e+00 : f32
    %42 = vector.broadcast %cst_14 : f32 to vector<8x128xf32>
    %43 = arith.addf %41, %42 : vector<8x128xf32>
    %44 = arith.divf %27, %43 : vector<8x128xf32>
    %45 = math.log %7 : vector<8x128xf32>
    %cst_15 = arith.constant -2.000000e+00 : f32
    %46 = vector.broadcast %cst_15 : f32 to vector<8x128xf32>
    %47 = arith.mulf %46, %45 : vector<8x128xf32>
    %48 = math.sqrt %47 : vector<8x128xf32>
    %cst_16 = arith.constant -0.0077848942 : f32
    %49 = vector.broadcast %cst_16 : f32 to vector<8x128xf32>
    %50 = arith.mulf %49, %48 : vector<8x128xf32>
    %cst_17 = arith.constant -0.322396457 : f32
    %51 = vector.broadcast %cst_17 : f32 to vector<8x128xf32>
    %52 = arith.addf %50, %51 : vector<8x128xf32>
    %53 = arith.mulf %52, %48 : vector<8x128xf32>
    %cst_18 = arith.constant -2.40075827 : f32
    %54 = vector.broadcast %cst_18 : f32 to vector<8x128xf32>
    %55 = arith.addf %53, %54 : vector<8x128xf32>
    %56 = arith.mulf %55, %48 : vector<8x128xf32>
    %cst_19 = arith.constant -2.54973245 : f32
    %57 = vector.broadcast %cst_19 : f32 to vector<8x128xf32>
    %58 = arith.addf %56, %57 : vector<8x128xf32>
    %59 = arith.mulf %58, %48 : vector<8x128xf32>
    %cst_20 = arith.constant 4.37466431 : f32
    %60 = vector.broadcast %cst_20 : f32 to vector<8x128xf32>
    %61 = arith.addf %59, %60 : vector<8x128xf32>
    %62 = arith.mulf %61, %48 : vector<8x128xf32>
    %cst_21 = arith.constant 2.938164 : f32
    %63 = vector.broadcast %cst_21 : f32 to vector<8x128xf32>
    %64 = arith.addf %62, %63 : vector<8x128xf32>
    %cst_22 = arith.constant 0.00778469583 : f32
    %65 = vector.broadcast %cst_22 : f32 to vector<8x128xf32>
    %66 = arith.mulf %65, %48 : vector<8x128xf32>
    %cst_23 = arith.constant 0.322467119 : f32
    %67 = vector.broadcast %cst_23 : f32 to vector<8x128xf32>
    %68 = arith.addf %66, %67 : vector<8x128xf32>
    %69 = arith.mulf %68, %48 : vector<8x128xf32>
    %cst_24 = arith.constant 2.44513416 : f32
    %70 = vector.broadcast %cst_24 : f32 to vector<8x128xf32>
    %71 = arith.addf %69, %70 : vector<8x128xf32>
    %72 = arith.mulf %71, %48 : vector<8x128xf32>
    %cst_25 = arith.constant 3.7544086 : f32
    %73 = vector.broadcast %cst_25 : f32 to vector<8x128xf32>
    %74 = arith.addf %72, %73 : vector<8x128xf32>
    %75 = arith.mulf %74, %48 : vector<8x128xf32>
    %cst_26 = arith.constant 1.000000e+00 : f32
    %76 = vector.broadcast %cst_26 : f32 to vector<8x128xf32>
    %77 = arith.addf %75, %76 : vector<8x128xf32>
    %78 = arith.divf %64, %77 : vector<8x128xf32>
    %cst_27 = arith.constant 1.000000e+00 : f32
    %79 = vector.broadcast %cst_27 : f32 to vector<8x128xf32>
    %80 = arith.subf %79, %7 : vector<8x128xf32>
    %81 = math.log %80 : vector<8x128xf32>
    %cst_28 = arith.constant -2.000000e+00 : f32
    %82 = vector.broadcast %cst_28 : f32 to vector<8x128xf32>
    %83 = arith.mulf %82, %81 : vector<8x128xf32>
    %84 = math.sqrt %83 : vector<8x128xf32>
    %cst_29 = arith.constant -0.0077848942 : f32
    %85 = vector.broadcast %cst_29 : f32 to vector<8x128xf32>
    %86 = arith.mulf %85, %84 : vector<8x128xf32>
    %cst_30 = arith.constant -0.322396457 : f32
    %87 = vector.broadcast %cst_30 : f32 to vector<8x128xf32>
    %88 = arith.addf %86, %87 : vector<8x128xf32>
    %89 = arith.mulf %88, %84 : vector<8x128xf32>
    %cst_31 = arith.constant -2.40075827 : f32
    %90 = vector.broadcast %cst_31 : f32 to vector<8x128xf32>
    %91 = arith.addf %89, %90 : vector<8x128xf32>
    %92 = arith.mulf %91, %84 : vector<8x128xf32>
    %cst_32 = arith.constant -2.54973245 : f32
    %93 = vector.broadcast %cst_32 : f32 to vector<8x128xf32>
    %94 = arith.addf %92, %93 : vector<8x128xf32>
    %95 = arith.mulf %94, %84 : vector<8x128xf32>
    %cst_33 = arith.constant 4.37466431 : f32
    %96 = vector.broadcast %cst_33 : f32 to vector<8x128xf32>
    %97 = arith.addf %95, %96 : vector<8x128xf32>
    %98 = arith.mulf %97, %84 : vector<8x128xf32>
    %cst_34 = arith.constant 2.938164 : f32
    %99 = vector.broadcast %cst_34 : f32 to vector<8x128xf32>
    %100 = arith.addf %98, %99 : vector<8x128xf32>
    %cst_35 = arith.constant 0.000000e+00 : f32
    %101 = vector.broadcast %cst_35 : f32 to vector<8x128xf32>
    %102 = arith.subf %101, %100 : vector<8x128xf32>
    %cst_36 = arith.constant 0.00778469583 : f32
    %103 = vector.broadcast %cst_36 : f32 to vector<8x128xf32>
    %104 = arith.mulf %103, %84 : vector<8x128xf32>
    %cst_37 = arith.constant 0.322467119 : f32
    %105 = vector.broadcast %cst_37 : f32 to vector<8x128xf32>
    %106 = arith.addf %104, %105 : vector<8x128xf32>
    %107 = arith.mulf %106, %84 : vector<8x128xf32>
    %cst_38 = arith.constant 2.44513416 : f32
    %108 = vector.broadcast %cst_38 : f32 to vector<8x128xf32>
    %109 = arith.addf %107, %108 : vector<8x128xf32>
    %110 = arith.mulf %109, %84 : vector<8x128xf32>
    %cst_39 = arith.constant 3.7544086 : f32
    %111 = vector.broadcast %cst_39 : f32 to vector<8x128xf32>
    %112 = arith.addf %110, %111 : vector<8x128xf32>
    %113 = arith.mulf %112, %84 : vector<8x128xf32>
    %cst_40 = arith.constant 1.000000e+00 : f32
    %114 = vector.broadcast %cst_40 : f32 to vector<8x128xf32>
    %115 = arith.addf %113, %114 : vector<8x128xf32>
    %116 = arith.divf %102, %115 : vector<8x128xf32>
    %cst_41 = arith.constant 2.425000e-02 : f32
    %117 = vector.broadcast %cst_41 : f32 to vector<8x128xf32>
    %118 = arith.cmpf olt, %7, %117 : vector<8x128xf32>
    %119 = arith.select %118, %78, %44 : vector<8x128xi1>, vector<8x128xf32>
    %cst_42 = arith.constant 9.757500e-01 : f32
    %120 = vector.broadcast %cst_42 : f32 to vector<8x128xf32>
    %121 = arith.cmpf ogt, %7, %120 : vector<8x128xf32>
    %122 = arith.select %121, %116, %119 : vector<8x128xi1>, vector<8x128xf32>
    %c0_43 = arith.constant 0 : index
    %c0_44 = arith.constant 0 : index
    %123 = vector.load %arg2[%c0_43, %c0_44] : memref<8x128xf32, #tpu.memory_space<vmem>>, vector<8x128xf32>
    tpu.vector_store %arg2[%c0_43, %c0_44], %122 {strides = array<i32>} : memref<8x128xf32, #tpu.memory_space<vmem>>, vector<8x128xf32>,
    return
  }
  func.func @transform_0(%arg0: i32) -> (i32, i32) {
    %c0_i32 = arith.constant 0 : i32
    %c0_i32_0 = arith.constant 0 : i32
    return %arg0, %c0_i32 : i32, i32
  }
  func.func @transform_1(%arg0: i32) -> (i32, i32) {
    %c0_i32 = arith.constant 0 : i32
    %c0_i32_0 = arith.constant 0 : i32
    return %arg0, %c0_i32 : i32, i32
  }
}

</mosaic_0001>

<bundles_post_ra>
// kernel: latent_distribution_forward.1
= control target key start
LH: loop header
LB: loop body
LE: loop exit
PB: predicated region body
PF: predicated region fallthrough
CT: control target
= control target key end

     0   :  { %s199_s0 = inlined_call_operand.vmem [shape: s32[8,128], index: 0, kind: input, shape index: {}]   ;;  %s200_s1 = inlined_call_operand.hbm [shape: f32[8,128], index: 1, kind: output, shape index: {}]  }
   0x1   :  { %v9_v0 = vld [vmem:[%s199_s0] sm:$0xff] }
   0x2   :  { %6 = vsyncpa [#allocation3], 0  ;;  %v10_v1 = vand.u32 8388607, %v9_v0  ;;  %s158_s0 = smov [#allocation2]  }
   0x3   :  { %s112_s8 = sshll.u32 %s158_s0, 4  ;;  %s113_s8 = int_to_ptr.vmem [resolvable:$true] %s112_s8 }
   0x4   :  { %v11_v2 = vcvt.s32.f32 %v10_v1  ;;  %s136_s9 = scalar_lea.vmem %s113_s8, 128  ;;  %p141_p1 = scmp.lt.s32.totalorder %s113_s8, %s113_s8 }
   0x5   :  { %p137_p0 = scmp.ne.s32.totalorder %s113_s8, %s136_s9  ;;  %p142_p2 = scmp.lt.s32.totalorder %s136_s9, %s136_s9 }
   0x6   :  { %v12_v3 = vadd.f32 0.5, %v11_v2 }
   0x7   :  { %p143_p3 = por %p142_p2, %p141_p1 }
   0x8   :  { %v172_v4 = vmul.f32 1.1920929e-07, %v12_v3 }
   0x9   :  { %p144_p4 = pnand %p143_p3, %p137_p0 }
   0xa   :  { %v175_v5 = vadd.f32 -0.5, %v172_v4  ;;  %122 = vlog2.f32 %v172_v4  ;;  %v69_v6 = vsub.f32 1.0, %v172_v4  ;;  %vm101_vm4 = vcmp.lt.f32.partialorder %v172_v4, 0.02425 }
   0xb   :  { %vm103_vm5 = vcmp.gt.f32.partialorder %v172_v4, 0.97575 }
   0xc   :  { %124 = vlog2.f32 %v69_v6  ;;  %v181_v7 = vmul.f32 %v175_v5, %v175_v5 }
   0xe   :  { %v27_v8 = vmul.f32 -54.476097, %v181_v7  ;;  %v16_v17 = vmul.f32 -39.69683, %v181_v7 }
  0x10   :  { %v28_v9 = vadd.f32 161.58583, %v27_v8  ;;  %v17_v19 = vadd.f32 220.9461, %v16_v17 }
  0x12   :  { %v29_v13 = vmul.f32 %v28_v9, %v181_v7  ;;  %v18_v21 = vmul.f32 %v17_v19, %v181_v7 }
  0x14   :  { %v30_v18 = vadd.f32 -155.69897, %v29_v13  ;;  %v19_v25 = vadd.f32 -275.9285, %v18_v21 }
  0x16   :  { %v31_v20 = vmul.f32 %v30_v18, %v181_v7  ;;  %v20_v33 = vmul.f32 %v19_v25, %v181_v7 }
  0x17   :  { %v123_v10 = vpop.eup %122 }
  0x18   :  { %v40_v11 = vmul.f32 0.6931472, %v123_v10  ;;  %v32_v22 = vadd.f32 66.801315, %v31_v20  ;;  %v21_v43 = vadd.f32 138.35776, %v20_v33 }
  0x19   :  { %v125_v12 = vpop.eup %124 }
  0x1a   :  { %v41_v14 = vmul.f32 -2.0, %v40_v11  ;;  %v71_v15 = vmul.f32 0.6931472, %v125_v12  ;;  %v33_v26 = vmul.f32 %v32_v22, %v181_v7  ;;  %v22_v53 = vmul.f32 %v21_v43, %v181_v7 }
  0x1c   :  { %126 = vrsqrt.f32 %v41_v14  ;;  %v72_v16 = vmul.f32 -2.0, %v71_v15  ;;  %vm44_vm0 = vcmp.eq.f32.partialorder %v41_v14, inf  ;;  %v47_v24 = vand.u32 2147483648, %v41_v14 }
  0x1d   :  { %vm46_vm1 = vcmp.eq.f32.partialorder %v41_v14, 0.0  ;;  %v34_v34 = vadd.f32 -13.280682, %v33_v26  ;;  %v23_v63 = vadd.f32 -30.664799, %v22_v53 }
  0x1e   :  { %128 = vrsqrt.f32 %v72_v16  ;;  %vm75_vm2 = vcmp.eq.f32.partialorder %v72_v16, inf  ;;  %v78_v30 = vand.u32 2147483648, %v72_v16  ;;  %vm77_vm3 = vcmp.eq.f32.partialorder %v72_v16, 0.0 }
  0x1f   :  { %v35_v44 = vmul.f32 %v34_v34, %v181_v7  ;;  %v24_v10 = vmul.f32 %v23_v63, %v181_v7 }
  0x21   :  { %v36_v54 = vadd.f32 1.0, %v35_v44 }
  0x23   :  { %130 = vrcp.f32 %v36_v54 }
  0x29   :  { %v127_v23 = vpop.eup %126 }
  0x2a   :  { %v43_v27 = vmul.f32 %v127_v23, %v41_v14 }
  0x2b   :  { %v129_v28 = vpop.eup %128 }
  0x2c   :  { %v45_v29 = vsel %vm44_vm0, %v41_v14, %v43_v27  ;;  %v74_v32 = vmul.f32 %v129_v28, %v72_v16  ;;  %v25_v14 = vadd.f32 2.5066283, %v24_v10 }
  0x2d   :  { %v48_v31 = vsel %vm46_vm1, %v47_v24, %v45_v29 }
  0x2e   :  { %v49_v35 = vmul.f32 -0.007784894, %v48_v31  ;;  %v59_v36 = vmul.f32 0.007784696, %v48_v31  ;;  %v76_v37 = vsel %vm75_vm2, %v72_v16, %v74_v32  ;;  %v26_v17 = vmul.f32 %v175_v5, %v25_v14 }
  0x2f   :  { %v79_v40 = vsel %vm77_vm3, %v78_v30, %v76_v37 }
  0x30   :  { %v50_v38 = vadd.f32 -0.32239646, %v49_v35  ;;  %v60_v39 = vadd.f32 0.32246712, %v59_v36  ;;  %v80_v41 = vmul.f32 -0.007784894, %v79_v40  ;;  %v131_v18 = vpop.eup %130 }
  0x31   :  { %v91_v42 = vmul.f32 0.007784696, %v79_v40  ;;  %v38_v21 = vmul.f32 %v131_v18, %v26_v17 }
  0x32   :  { %v51_v45 = vmul.f32 %v50_v38, %v48_v31  ;;  %v61_v46 = vmul.f32 %v60_v39, %v48_v31  ;;  %v81_v47 = vadd.f32 -0.32239646, %v80_v41 }
  0x33   :  { %v92_v48 = vadd.f32 0.32246712, %v91_v42 }
  0x34   :  { %v52_v49 = vadd.f32 -2.4007583, %v51_v45  ;;  %v62_v50 = vadd.f32 2.4451342, %v61_v46  ;;  %v82_v51 = vmul.f32 %v81_v47, %v79_v40 }
  0x35   :  { %v93_v52 = vmul.f32 %v92_v48, %v79_v40 }
  0x36   :  { %v53_v55 = vmul.f32 %v52_v49, %v48_v31  ;;  %v63_v56 = vmul.f32 %v62_v50, %v48_v31  ;;  %v83_v57 = vadd.f32 -2.4007583, %v82_v51 }
  0x37   :  { %v94_v58 = vadd.f32 2.4451342, %v93_v52 }
  0x38   :  { %v54_v59 = vadd.f32 -2.5497324, %v53_v55  ;;  %v64_v60 = vadd.f32 3.7544086, %v63_v56  ;;  %v84_v61 = vmul.f32 %v83_v57, %v79_v40 }
  0x39   :  { %v95_v62 = vmul.f32 %v94_v58, %v79_v40 }
  0x3a   :  { %v65_v0 = vmul.f32 %v64_v60, %v48_v31  ;;  %v85_v1 = vadd.f32 -2.5497324, %v84_v61  ;;  %v55_v3 = vmul.f32 %v54_v59, %v48_v31 }
  0x3b   :  { %v96_v2 = vadd.f32 3.7544086, %v95_v62 }
  0x3c   :  { %v66_v6 = vadd.f32 1.0, %v65_v0  ;;  %v86_v8 = vmul.f32 %v85_v1, %v79_v40  ;;  %v56_v13 = vadd.f32 4.3746643, %v55_v3 }
  0x3d   :  { %v97_v9 = vmul.f32 %v96_v2, %v79_v40 }
  0x3e   :  { %132 = vrcp.f32 %v66_v6  ;;  %v87_v11 = vadd.f32 4.3746643, %v86_v8  ;;  %v57_v16 = vmul.f32 %v56_v13, %v48_v31 }
  0x3f   :  { %v98_v12 = vadd.f32 1.0, %v97_v9 }
  0x40   :  { %v88_v15 = vmul.f32 %v87_v11, %v79_v40  ;;  %v58_v20 = vadd.f32 2.938164, %v57_v16 }
  0x41   :  { %134 = vrcp.f32 %v98_v12 }
  0x42   :  { %v89_v19 = vadd.f32 2.938164, %v88_v15 }
  0x44   :  { %v90_v23 = vsub.f32 0.0, %v89_v19 }
  0x4b   :  { %v133_v22 = vpop.eup %132 }
  0x4c   :  { %v68_v24 = vmul.f32 %v133_v22, %v58_v20 }
  0x4e   :  { %v135_v7 = vpop.eup %134  ;;  %v102_v25 = vsel %vm101_vm4, %v68_v24, %v38_v21 }
  0x4f   :  { %v100_v26 = vmul.f32 %v135_v7, %v90_v23 }
  0x51   :  { %v104_v27 = vsel %vm103_vm5, %v100_v26, %v102_v25 }
  0x52   :  { %105 = vst [vmem:[#allocation2] sm:$0xff] %v104_v27 }
  0x53   :  { %147 = shalt.err (!%p144_p4)
}
  0x54   :  { %115 = dma.vmem_to_hbm [thread:$0]  %s113_s8, 128, %s200_s1, [#allocation3]  }
  0x55   :  { %156 = dma.done.wait [#allocation3], 128  }
  0x56   :  { %157 = vsyncadd [#allocation3], 4294967168 }
  0x57   :  { %119 = vsyncpa [#allocation3], 1 }

</bundles_post_ra>
